<compile_context>
chip_gen: v5e
topology: v5e:2x2
jax: 0.10.0
libtpu: 0.0.40
codegen_flags: <defaults>
</compile_context>

<pallas_src>
import functools
import inspect

import jax
import jax.numpy as jnp
from jax.experimental import pallas as pl
from jax.experimental.pallas import tpu as pltpu

_LANE = 128


def _round_up(x, m):
    return (x + m - 1) // m * m


# --------------------------------------------------------------------------
# Hardware introspection (generation-aware padding / VMEM limits)
# --------------------------------------------------------------------------
def _tpu_generation():
    """Best-effort TPU generation tag: 'v5' | 'v6' | 'v7' | None."""
    try:
        kind = jax.devices()[0].device_kind.lower()
    except Exception:
        return None
    if "v7" in kind or "7x" in kind:
        return "v7"
    if "v6" in kind:
        return "v6"
    if "v5" in kind:
        return "v5"
    return None


def _vmem_capacity_bytes(gen):
    try:
        cap = int(pltpu.get_tpu_info().vmem_capacity_bytes)
        if cap > 0:
            return cap
    except Exception:
        pass
    # Fallbacks: v7x has 64 MiB per TensorCore; v5e/v6e have 128 MiB.
    return (64 if gen == "v7" else 128) * 1024 * 1024


def _feature_pad(dim, gen):
    """Lane-dense padding of a feature dim; 256-wide on v6e/v7x MXUs when the
    true dim is large enough to benefit, else 128."""
    if gen in ("v6", "v7") and dim >= 192:
        return _round_up(dim, 256)
    return _round_up(dim, _LANE)


@functools.lru_cache(maxsize=None)
def _single_buffered_weights_supported():
    """Feature-probe `pipeline_mode=pl.Buffered(1)` once on a tiny dummy kernel
    so the real kernel never hides genuine lowering errors behind a fallback."""
    if not hasattr(pl, "Buffered"):
        return False
    try:
        if "pipeline_mode" not in inspect.signature(pl.BlockSpec).parameters:
            return False
    except (TypeError, ValueError):
        pass

    def _probe(w_ref, x_ref, o_ref):
        o_ref[...] = x_ref[...] + w_ref[...]

    try:
        fn = pl.pallas_call(
            _probe,
            out_shape=jax.ShapeDtypeStruct((16, 128), jnp.float32),
            grid_spec=pltpu.PrefetchScalarGridSpec(
                num_scalar_prefetch=0,
                grid=(2,),
                in_specs=[
                    pl.BlockSpec((8, 128), lambda i: (0, 0),
                                 pipeline_mode=pl.Buffered(1)),
                    pl.BlockSpec((8, 128), lambda i: (i, 0)),
                ],
                out_specs=pl.BlockSpec((8, 128), lambda i: (i, 0)),
            ),
        )
        jax.jit(fn).lower(jnp.zeros((8, 128), jnp.float32),
                          jnp.zeros((16, 128), jnp.float32)).compile()
        return True
    except Exception:
        return False


# --------------------------------------------------------------------------
# Kernel
# --------------------------------------------------------------------------
def _mlp_kernel(x_ref,
                w1_ref, b1_ref,
                w2_ref, b2_ref,
                w3_ref, b3_ref,
                w4_ref, b4_ref,
                o_ref, *, epilogue_dtype):
    cdt = w1_ref.dtype          # MXU compute dtype (bf16 or f32)
    edt = epilogue_dtype        # VPU epilogue dtype (bf16 on v6e/v7x, else f32)

    def linear_relu(h, w_ref, b_ref):
        acc = jnp.dot(h, w_ref[...], preferred_element_type=jnp.float32)
        act = acc.astype(edt) + b_ref[...].astype(edt)
        return jnp.maximum(act, 0.0).astype(cdt)

    h = x_ref[...].astype(cdt)                    # f32 -> compute dtype in-kernel
    h = linear_relu(h, w1_ref, b1_ref)            # layer 1 + ReLU
    h = linear_relu(h, w2_ref, b2_ref)            # layer 2 + ReLU
    h = linear_relu(h, w3_ref, b3_ref)            # layer 3 + ReLU
    out = jnp.dot(h, w4_ref[...], preferred_element_type=jnp.float32)
    out = out + b4_ref[...].astype(jnp.float32)   # final bias-add stays f32
    o_ref[...] = out.astype(o_ref.dtype)


# --------------------------------------------------------------------------
# One-time parameter preparation (padding / cast hoisted out of the call path)
# --------------------------------------------------------------------------
def prepare_params(params, *, compute_dtype=jnp.bfloat16, generation=None):
    """Pad + cast the weights once.  params: w1..w4 as (in, out), b1..b4 as
    (out,) or (1, out).  Returns a dict consumed by neural_net_links_forward."""
    gen = _tpu_generation() if generation is None else generation

    input_size = params["w1"].shape[0]
    hidden = params["w1"].shape[1]
    num_classes = params["w4"].shape[1]

    h_p = _feature_pad(hidden, gen)
    nc_p = _feature_pad(num_classes, gen)

    def pad2(a, rows, cols, dtype):
        a = jnp.asarray(a)
        if a.ndim == 1:
            a = a[None, :]
        a = a.astype(dtype)
        return jnp.pad(a, ((0, rows - a.shape[0]), (0, cols - a.shape[1])))

    cdt = jnp.dtype(compute_dtype)
    if cdt == jnp.dtype(jnp.float32) or gen in ("v5", None):
        epilogue_dtype = jnp.float32            # v5e has no native bf16 VPU
    else:
        epilogue_dtype = compute_dtype          # bf16 epilogue on v6e/v7x

    prepared = {
        # NOTE: w1's input dim is NOT padded (x keeps its true feature dim).
        "w1": pad2(params["w1"], input_size, h_p, compute_dtype),
        "w2": pad2(params["w2"], h_p, h_p, compute_dtype),
        "w3": pad2(params["w3"], h_p, h_p, compute_dtype),
        "w4": pad2(params["w4"], h_p, nc_p, compute_dtype),
        "b1": pad2(params["b1"], 1, h_p, jnp.float32),
        "b2": pad2(params["b2"], 1, h_p, jnp.float32),
        "b3": pad2(params["b3"], 1, h_p, jnp.float32),
        "b4": pad2(params["b4"], 1, nc_p, jnp.float32),
        "input_size": int(input_size),
        "hidden": int(hidden),
        "num_classes": int(num_classes),
        "h_p": int(h_p),
        "nc_p": int(nc_p),
        "compute_dtype": cdt,
        "epilogue_dtype": jnp.dtype(epilogue_dtype),
        "generation": gen,
    }
    return prepared


def _pick_batch_tile(B, sub, input_size, h_p, nc_p, out_itemsize,
                     vmem_budget, resident_weight_bytes):
    """Largest sublane-aligned tile that fits VMEM, capped at 1024 rows, while
    keeping >= 4 grid steps (>= 2 per core on v7x megacore, >= 3 on 1-TC)."""
    x_row = 2 * input_size * 4            # double-buffered f32 x tile
    out_row = 2 * nc_p * out_itemsize     # double-buffered output tile
    act_row = 4 * h_p * 4                 # live f32 activation copies (headroom)
    row_bytes = x_row + out_row + act_row
    avail = max(vmem_budget - resident_weight_bytes, row_bytes * sub)
    max_rows = max(sub, (avail // row_bytes) // sub * sub)
    cap = min(1024, max_rows)

    min_steps = 4
    want = -(-B // min_steps)             # ceil(B / min_steps)
    tile = min(cap, _round_up(want, sub))
    return max(sub, tile)


# --------------------------------------------------------------------------
# Forward
# --------------------------------------------------------------------------
def neural_net_links_forward(x, prepared, *, batch_tile=None,
                             out_dtype=jnp.float32):
    """Fused forward pass of NeuralNetLinks.

    x: (B, input_size) float32 (unpadded, uncast — handled in-kernel).
    prepared: output of prepare_params().
    """
    B, input_size = x.shape
    assert input_size == prepared["input_size"], "feature dim mismatch"

    cdt = prepared["compute_dtype"]
    edt = prepared["epilogue_dtype"]
    gen = prepared["generation"]
    h_p, nc_p = prepared["h_p"], prepared["nc_p"]
    num_classes = prepared["num_classes"]
    out_itemsize = jnp.dtype(out_dtype).itemsize

    w1, w2, w3, w4 = prepared["w1"], prepared["w2"], prepared["w3"], prepared["w4"]
    b1, b2, b3, b4 = prepared["b1"], prepared["b2"], prepared["b3"], prepared["b4"]

    weight_bytes = sum(a.size * a.dtype.itemsize for a in (w1, w2, w3, w4))
    bias_bytes = sum(a.size * a.dtype.itemsize for a in (b1, b2, b3, b4))

    vmem_cap = _vmem_capacity_bytes(gen)
    vmem_budget = vmem_cap * 85 // 100

    sub = 16 if cdt == jnp.dtype(jnp.bfloat16) else 8
    if batch_tile is None:
        batch_tile = _pick_batch_tile(B, sub, input_size, h_p, nc_p,
                                      out_itemsize, vmem_budget,
                                      weight_bytes + bias_bytes)
    batch_tile = max(sub, _round_up(batch_tile, sub))
    pB = _round_up(B, batch_tile)
    grid = (pB // batch_tile,)

    # Pad the batch only when genuinely needed (no feature padding, no cast).
    xp = x if pB == B else jnp.pad(x, ((0, pB - B), (0, 0)))

    single_buffer_weights = _single_buffered_weights_supported()
    weight_bufs = 1 if single_buffer_weights else 2
    footprint = (weight_bufs * (weight_bytes + bias_bytes)
                 + 2 * batch_tile * (input_size * 4 + nc_p * out_itemsize)
                 + 4 * batch_tile * h_p * 4)
    vmem_limit = int(min(vmem_budget,
                         max(32 * 1024 * 1024, 2 * footprint + (8 << 20))))

    flops = 2 * pB * (input_size * h_p + 2 * h_p * h_p + h_p * nc_p)
    bytes_accessed = int(pB * input_size * 4 + weight_bytes + bias_bytes
                         + pB * nc_p * out_itemsize)
    cost = pl.CostEstimate(flops=flops, transcendentals=0,
                           bytes_accessed=bytes_accessed)

    def weight_spec(shape):
        idx = lambda i: tuple(0 for _ in shape)        # grid-invariant block
        if single_buffer_weights:
            return pl.BlockSpec(shape, idx, pipeline_mode=pl.Buffered(1))
        return pl.BlockSpec(shape, idx)

    in_specs = [
        pl.BlockSpec((batch_tile, input_size), lambda i: (i, 0)),   # x tile
        weight_spec(w1.shape), weight_spec(b1.shape),
        weight_spec(w2.shape), weight_spec(b2.shape),
        weight_spec(w3.shape), weight_spec(b3.shape),
        weight_spec(w4.shape), weight_spec(b4.shape),
    ]
    out_specs = pl.BlockSpec((batch_tile, nc_p), lambda i: (i, 0))

    kernel = functools.partial(_mlp_kernel, epilogue_dtype=edt)

    out_p = pl.pallas_call(
        kernel,
        out_shape=jax.ShapeDtypeStruct((pB, nc_p), out_dtype),
        grid_spec=pltpu.PrefetchScalarGridSpec(
            num_scalar_prefetch=0,
            grid=grid,
            in_specs=in_specs,
            out_specs=out_specs,
        ),
        compiler_params=pltpu.CompilerParams(
            dimension_semantics=("parallel",),
            vmem_limit_bytes=vmem_limit,
        ),
        cost_estimate=cost,
    )(xp, w1, b1, w2, b2, w3, b3, w4, b4)

    # Slice off batch/class padding (padded columns are exact zeros).
    return out_p[:B, :num_classes]


# --------------------------------------------------------------------------
# Init / reference (match PyTorch nn.Linear semantics)
# --------------------------------------------------------------------------
def init_params(key, input_size, hidden_size, num_classes):
    """Deterministic init matching PyTorch nn.Linear's U(-1/sqrt(fan_in), ...)."""
    def linear(key, fan_in, fan_out):
        kw, kb = jax.random.split(key)
        bound = 1.0 / jnp.sqrt(fan_in)
        # Stored as (in, out) for x @ W; bias kept 2D (1, out) for VMEM layout.
        w = jax.random.uniform(kw, (fan_in, fan_out), jnp.float32, -bound, bound)
        b = jax.random.uniform(kb, (1, fan_out), jnp.float32, -bound, bound)
        return w, b

    k1, k2, k3, k4 = jax.random.split(key, 4)
    w1, b1 = linear(k1, input_size, hidden_size)
    w2, b2 = linear(k2, hidden_size, hidden_size)
    w3, b3 = linear(k3, hidden_size, hidden_size)
    w4, b4 = linear(k4, hidden_size, num_classes)
    return dict(w1=w1, b1=b1, w2=w2, b2=b2, w3=w3, b3=b3, w4=w4, b4=b4)


def reference_forward(x, p):
    h = jnp.maximum(x @ p["w1"] + p["b1"], 0.0)
    h = jnp.maximum(h @ p["w2"] + p["b2"], 0.0)
    h = jnp.maximum(h @ p["w3"] + p["b3"], 0.0)
    return h @ p["w4"] + p["b4"]


if __name__ == "__main__":
    input_size, hidden_size, num_classes = 16, 32, 8
    batch = 256   # -> 4 grid steps of 64 rows: pipelined and megacore-shardable

    key = jax.random.PRNGKey(0)
    kx, kp = jax.random.split(key)
    x = jax.random.normal(kx, (batch, input_size), jnp.float32)
    params = init_params(kp, input_size, hidden_size, num_classes)

    ref = reference_forward(x, params)

    # f32 MXU path (tight numerical check).
    prep_f32 = prepare_params(params, compute_dtype=jnp.float32)
    out_f32 = jax.block_until_ready(neural_net_links_forward(x, prep_f32))
    assert out_f32.shape == (batch, num_classes)
    assert jnp.allclose(out_f32, ref, atol=1e-4, rtol=1e-4)

    # bf16 MXU path (default fast path; f32 accumulation, bf16 epilogue on v6e/v7x).
    prep_bf16 = prepare_params(params)   # one-time pad/cast, reused every call
    out_bf16 = jax.block_until_ready(neural_net_links_forward(x, prep_bf16))
    assert out_bf16.shape == (batch, num_classes)
    assert jnp.allclose(out_bf16, ref, atol=5e-2, rtol=5e-2)

    print("KERNEL_OK")
</pallas_src>

<mosaic_0001>
module attributes {stable_mosaic.version = 11 : i64} {
  func.func @_mlp_kernel(%arg0: i32, %arg1: memref<64x16xf32, #tpu.memory_space<vmem>>, %arg2: memref<16x128xf32, #tpu.memory_space<vmem>>, %arg3: memref<1x128xf32, #tpu.memory_space<vmem>>, %arg4: memref<128x128xf32, #tpu.memory_space<vmem>>, %arg5: memref<1x128xf32, #tpu.memory_space<vmem>>, %arg6: memref<128x128xf32, #tpu.memory_space<vmem>>, %arg7: memref<1x128xf32, #tpu.memory_space<vmem>>, %arg8: memref<128x128xf32, #tpu.memory_space<vmem>>, %arg9: memref<1x128xf32, #tpu.memory_space<vmem>>, %arg10: memref<64x128xf32, #tpu.memory_space<vmem>>) attributes {dimension_semantics = [#tpu.dimension_semantics<parallel>], iteration_bounds = array<i64: 4>, scalar_prefetch = 0 : i64, scratch_operands = 0 : i64, tpu.core_type = #tpu.core_type<tc>, window_params = [{transform_indices = @transform_0, window_bounds = array<i64: 64, 16>}, {pipeline_mode = #tpu.pipeline_mode<synchronous>, transform_indices = @transform_1, window_bounds = array<i64: 16, 128>}, {pipeline_mode = #tpu.pipeline_mode<synchronous>, transform_indices = @transform_2, window_bounds = array<i64: 1, 128>}, {pipeline_mode = #tpu.pipeline_mode<synchronous>, transform_indices = @transform_3, window_bounds = array<i64: 128, 128>}, {pipeline_mode = #tpu.pipeline_mode<synchronous>, transform_indices = @transform_4, window_bounds = array<i64: 1, 128>}, {pipeline_mode = #tpu.pipeline_mode<synchronous>, transform_indices = @transform_5, window_bounds = array<i64: 128, 128>}, {pipeline_mode = #tpu.pipeline_mode<synchronous>, transform_indices = @transform_6, window_bounds = array<i64: 1, 128>}, {pipeline_mode = #tpu.pipeline_mode<synchronous>, transform_indices = @transform_7, window_bounds = array<i64: 128, 128>}, {pipeline_mode = #tpu.pipeline_mode<synchronous>, transform_indices = @transform_8, window_bounds = array<i64: 1, 128>}, {transform_indices = @transform_9, window_bounds = array<i64: 64, 128>}]} {
    %c0 = arith.constant 0 : index
    %c0_0 = arith.constant 0 : index
    %0 = vector.load %arg1[%c0, %c0_0] : memref<64x16xf32, #tpu.memory_space<vmem>>, vector<64x16xf32>
    %c0_1 = arith.constant 0 : index
    %c0_2 = arith.constant 0 : index
    %1 = vector.load %arg2[%c0_1, %c0_2] : memref<16x128xf32, #tpu.memory_space<vmem>>, vector<16x128xf32>
    %cst = arith.constant dense<0.000000e+00> : vector<64x128xf32>
    %2 = tpu.matmul %0, %1, %cst {dimension_numbers = #tpu.dot_dimension_numbers<[1], [0], [0], [1], [0, 0, 1, 1], [], []>} : vector<64x16xf32>, vector<16x128xf32>, vector<64x128xf32> -> vector<64x128xf32>
    %c0_3 = arith.constant 0 : index
    %c0_4 = arith.constant 0 : index
    %3 = vector.load %arg3[%c0_3, %c0_4] : memref<1x128xf32, #tpu.memory_space<vmem>>, vector<1x128xf32>
    %4 = vector.broadcast %3 : vector<1x128xf32> to vector<64x128xf32>
    %5 = arith.addf %2, %4 : vector<64x128xf32>
    %cst_5 = arith.constant 0.000000e+00 : f32
    %6 = vector.broadcast %cst_5 : f32 to vector<64x128xf32>
    %7 = arith.maximumf %5, %6 : vector<64x128xf32>
    %c0_6 = arith.constant 0 : index
    %c0_7 = arith.constant 0 : index
    %8 = vector.load %arg4[%c0_6, %c0_7] : memref<128x128xf32, #tpu.memory_space<vmem>>, vector<128x128xf32>
    %cst_8 = arith.constant dense<0.000000e+00> : vector<64x128xf32>
    %9 = tpu.matmul %7, %8, %cst_8 {dimension_numbers = #tpu.dot_dimension_numbers<[1], [0], [0], [1], [0, 0, 1, 1], [], []>} : vector<64x128xf32>, vector<128x128xf32>, vector<64x128xf32> -> vector<64x128xf32>
    %c0_9 = arith.constant 0 : index
    %c0_10 = arith.constant 0 : index
    %10 = vector.load %arg5[%c0_9, %c0_10] : memref<1x128xf32, #tpu.memory_space<vmem>>, vector<1x128xf32>
    %11 = vector.broadcast %10 : vector<1x128xf32> to vector<64x128xf32>
    %12 = arith.addf %9, %11 : vector<64x128xf32>
    %cst_11 = arith.constant 0.000000e+00 : f32
    %13 = vector.broadcast %cst_11 : f32 to vector<64x128xf32>
    %14 = arith.maximumf %12, %13 : vector<64x128xf32>
    %c0_12 = arith.constant 0 : index
    %c0_13 = arith.constant 0 : index
    %15 = vector.load %arg6[%c0_12, %c0_13] : memref<128x128xf32, #tpu.memory_space<vmem>>, vector<128x128xf32>
    %cst_14 = arith.constant dense<0.000000e+00> : vector<64x128xf32>
    %16 = tpu.matmul %14, %15, %cst_14 {dimension_numbers = #tpu.dot_dimension_numbers<[1], [0], [0], [1], [0, 0, 1, 1], [], []>} : vector<64x128xf32>, vector<128x128xf32>, vector<64x128xf32> -> vector<64x128xf32>
    %c0_15 = arith.constant 0 : index
    %c0_16 = arith.constant 0 : index
    %17 = vector.load %arg7[%c0_15, %c0_16] : memref<1x128xf32, #tpu.memory_space<vmem>>, vector<1x128xf32>
    %18 = vector.broadcast %17 : vector<1x128xf32> to vector<64x128xf32>
    %19 = arith.addf %16, %18 : vector<64x128xf32>
    %cst_17 = arith.constant 0.000000e+00 : f32
    %20 = vector.broadcast %cst_17 : f32 to vector<64x128xf32>
    %21 = arith.maximumf %19, %20 : vector<64x128xf32>
    %c0_18 = arith.constant 0 : index
    %c0_19 = arith.constant 0 : index
    %22 = vector.load %arg8[%c0_18, %c0_19] : memref<128x128xf32, #tpu.memory_space<vmem>>, vector<128x128xf32>
    %cst_20 = arith.constant dense<0.000000e+00> : vector<64x128xf32>
    %23 = tpu.matmul %21, %22, %cst_20 {dimension_numbers = #tpu.dot_dimension_numbers<[1], [0], [0], [1], [0, 0, 1, 1], [], []>} : vector<64x128xf32>, vector<128x128xf32>, vector<64x128xf32> -> vector<64x128xf32>
    %c0_21 = arith.constant 0 : index
    %c0_22 = arith.constant 0 : index
    %24 = vector.load %arg9[%c0_21, %c0_22] : memref<1x128xf32, #tpu.memory_space<vmem>>, vector<1x128xf32>
    %25 = vector.broadcast %24 : vector<1x128xf32> to vector<64x128xf32>
    %26 = arith.addf %23, %25 : vector<64x128xf32>
    %c0_23 = arith.constant 0 : index
    %c0_24 = arith.constant 0 : index
    %27 = vector.load %arg10[%c0_23, %c0_24] : memref<64x128xf32, #tpu.memory_space<vmem>>, vector<64x128xf32>
    tpu.vector_store %arg10[%c0_23, %c0_24], %26 {strides = array<i32>} : memref<64x128xf32, #tpu.memory_space<vmem>>, vector<64x128xf32>,
    return
  }
  func.func @transform_0(%arg0: i32) -> (i32, i32) {
    %c0_i32 = arith.constant 0 : i32
    %c0_i32_0 = arith.constant 0 : i32
    return %arg0, %c0_i32 : i32, i32
  }
  func.func @transform_1(%arg0: i32) -> (i32, i32) {
    %c0_i32 = arith.constant 0 : i32
    %c0_i32_0 = arith.constant 0 : i32
    %c0_i32_1 = arith.constant 0 : i32
    return %c0_i32, %c0_i32_0 : i32, i32
  }
  func.func @transform_2(%arg0: i32) -> (i32, i32) {
    %c0_i32 = arith.constant 0 : i32
    %c0_i32_0 = arith.constant 0 : i32
    %c0_i32_1 = arith.constant 0 : i32
    return %c0_i32, %c0_i32_0 : i32, i32
  }
  func.func @transform_3(%arg0: i32) -> (i32, i32) {
    %c0_i32 = arith.constant 0 : i32
    %c0_i32_0 = arith.constant 0 : i32
    %c0_i32_1 = arith.constant 0 : i32
    return %c0_i32, %c0_i32_0 : i32, i32
  }
  func.func @transform_4(%arg0: i32) -> (i32, i32) {
    %c0_i32 = arith.constant 0 : i32
    %c0_i32_0 = arith.constant 0 : i32
    %c0_i32_1 = arith.constant 0 : i32
    return %c0_i32, %c0_i32_0 : i32, i32
  }
  func.func @transform_5(%arg0: i32) -> (i32, i32) {
    %c0_i32 = arith.constant 0 : i32
    %c0_i32_0 = arith.constant 0 : i32
    %c0_i32_1 = arith.constant 0 : i32
    return %c0_i32, %c0_i32_0 : i32, i32
  }
  func.func @transform_6(%arg0: i32) -> (i32, i32) {
    %c0_i32 = arith.constant 0 : i32
    %c0_i32_0 = arith.constant 0 : i32
    %c0_i32_1 = arith.constant 0 : i32
    return %c0_i32, %c0_i32_0 : i32, i32
  }
  func.func @transform_7(%arg0: i32) -> (i32, i32) {
    %c0_i32 = arith.constant 0 : i32
    %c0_i32_0 = arith.constant 0 : i32
    %c0_i32_1 = arith.constant 0 : i32
    return %c0_i32, %c0_i32_0 : i32, i32
  }
  func.func @transform_8(%arg0: i32) -> (i32, i32) {
    %c0_i32 = arith.constant 0 : i32
    %c0_i32_0 = arith.constant 0 : i32
    %c0_i32_1 = arith.constant 0 : i32
    return %c0_i32, %c0_i32_0 : i32, i32
  }
  func.func @transform_9(%arg0: i32) -> (i32, i32) {
    %c0_i32 = arith.constant 0 : i32
    %c0_i32_0 = arith.constant 0 : i32
    return %arg0, %c0_i32 : i32, i32
  }
}

</mosaic_0001>

<bundles_post_ra>
// kernel: tpu_custom_call.1
= control target key start
LH: loop header
LB: loop body
LE: loop exit
PB: predicated region body
PF: predicated region fallthrough
CT: control target
= control target key end

     0   :  { %14 = vsyncpa [#allocation3], 0  ;;  %s1200_s0 = inlined_call_operand.vmem [shape: f32[256,16], index: 0, kind: input, shape index: {}]   ;;  %s1201_s1 = inlined_call_operand.vmem [shape: f32[16,128], index: 1, kind: input, shape index: {}]   ;;  %s1202_s2 = inlined_call_operand.vmem [shape: f32[1,128], index: 2, kind: input, shape index: {}]   ;;  %s1203_s3 = inlined_call_operand.vmem [shape: f32[128,128], index: 3, kind: input, shape index: {}]   ;;  %s1204_s4 = inlined_call_operand.vmem [shape: f32[1,128], index: 4, kind: input, shape index: {}]   ;;  %s1205_s5 = inlined_call_operand.vmem [shape: f32[128,128], index: 5, kind: input, shape index: {}]   ;;  %s1206_s6 = inlined_call_operand.vmem [shape: f32[1,128], index: 6, kind: input, shape index: {}]   ;;  %s1207_s7 = inlined_call_operand.hbm [shape: f32[128,128], index: 7, kind: input, shape index: {}]   ;;  %s1208_s8 = inlined_call_operand.vmem [shape: f32[1,128], index: 8, kind: input, shape index: {}]   ;;  %s1209_s9 = inlined_call_operand.hbm [shape: f32[256,128], index: 9, kind: output, shape index: {}]  }
   0x1   :  { %15 = vsyncpa [#allocation4], 0 }
   0x2   :  { %17 = vsyncpa [#allocation4 + $0x1], 0  ;;  %s970_s30 = smov 0   ;;  %s972_s10 = smov 0  }
   0x3   :  { %s974_s11 = smov 0   ;;  %s976_s12 = smov 0  }
   0x4 LB: > { %s991_s13 = sadd.s32 4294967295, %s913_s12   ;;  %s736_s14 = sadd.s32 4294967294, %s913_s12   ;;  %s913_s12 = sphi %s976_s12, %s1215_s12   ;;  %s909_s11 = sphi %s974_s11, %s1214_s11   ;;  %s905_s10 = sphi %s972_s10, %s1213_s10   ;;  %s901_s30 = sphi %s970_s30, %s1212_s30  }
   0x5   : > { %s995_s15 = sadd.s32 1, %s913_s12   ;;  %s224_s16 = sadd.s32 1, %s909_s11 }
   0x6   : > { %s221_s17 = ssub.s32 %s913_s12, %s995_s15  ;;  %p234_p0 = scmp.ne.s32.totalorder %s909_s11, %s905_s10 }
   0x7   : > { %p222_p1 = scmp.eq.s32.totalorder %s221_s17, 0  ;;  %p235_p2 = scmp.eq.s32.totalorder %s991_s13, 3 }
   0x8   : > { %p240_p3 = scmp.ne.s32.totalorder %s905_s10, %s901_s30  ;;  %p241_p4 = scmp.eq.s32.totalorder %s736_s14, 3 }
   0x9   : > { %s1006_s18 = scalar_select %p222_p1, %s909_s11, %s224_s16  }
   0xa   : > { %p1008_p5 = por %p235_p2, %p234_p0  ;;  %p1012_p6 = por %p241_p4, %p240_p3 }
   0xb   : > { %p737_p7 = scmp.ge.s32.totalorder %s913_s12, 1  ;;  %p248_p8 = scmp.lt.s32.totalorder %s913_s12, 5 }
   0xc   : > { %p773_p9 = scmp.eq.s32.totalorder %s991_s13, 0  ;;  %s277_s23 = sshll.u32 %s1207_s7, 4  ;;  %s278_s23 = int_to_ptr.hbm [resolvable:$true] %s277_s23 }
   0xd   : > { %p249_p10 = pnand %p737_p7, %p248_p8  ;;  %s915_s24 = smov [#allocation2]  }
   0xe   : > { %s279_s25 = sshll.u32 %s915_s24, 4  ;;  %s916_s26 = smov 128   ;;  %s280_s25 = int_to_ptr.vmem [resolvable:$true] %s279_s25 }
   0xf   : > { %p765_p11 = pneg %p249_p10  ;;  %s917_s27 = smov 8  }
  0x10   : > { %307 = sbr.rel (%p249_p10) target bundleno = 619 (0x26b), region = 56 }
  0x11   : > { %p766_p12 = pnand %p773_p9, %p765_p11 }
  0x13   : > { %768 = dma.hbm_to_vmem [thread:$0]  (!%p766_p12), %s278_s23, 2048, %s280_s25, [#allocation3], %s916_s26, %s916_s26, %s917_s27  }
  0x15   : > { %892 = dma.done.wait (%p773_p9), [#allocation3], 2048  }
  0x16   : > { %894 = vsyncadd (%p773_p9), [#allocation3], 4294965248  ;;  %s743_s28 = sshll.u32 %s991_s13, 3  ;;  %v360_v0 = vld [vmem:[%s1201_s1 + $0x8] sm:$0xff]  ;;  %v359_v1 = vld [vmem:[%s1201_s1] sm:$0xff]  ;;  %vm365_vm0 = vcmask 130048  }
  0x17   : > { %p345_p13 = scmp.lt.s32.totalorder %s743_s28, 31  ;;  %404 = vmatpush.msra.mxu0 %v360_v0  ;;  %v454_v6 = vld [vmem:[%s1203_s3 + $0x78] sm:$0xff]  ;;  %v453_v7 = vld [vmem:[%s1203_s3 + $0x70] sm:$0xff]  ;;  %v452_v8 = vld [vmem:[%s1203_s3 + $0x68] sm:$0xff]  ;;  %s758_s14 = sshll.u32 %s991_s13, 6 }
  0x18   : > { %459 = vmatpush.msra.mxu1 %v454_v6  ;;  %v451_v9 = vld [vmem:[%s1203_s3 + $0x60] sm:$0xff]  ;;  %v450_v11 = vld [vmem:[%s1203_s3 + $0x58] sm:$0xff]  ;;  %v449_v12 = vld [vmem:[%s1203_s3 + $0x50] sm:$0xff]  ;;  %s658_s22 = scalar_lea.hbm %s1209_s9, %s758_s14  ;;  %s867_s14 = scalar_lea.hbm %s1209_s9, 256 }
  0x19   : > { %s1217_s28 = smov (!%p345_p13, %s743_s28), 31  ;;  %405 = vmatpush.msra.mxu0 %v359_v1  ;;  %v448_v13 = vld [vmem:[%s1203_s3 + $0x48] sm:$0xff]  ;;  %v447_v14 = vld [vmem:[%s1203_s3 + $0x40] sm:$0xff]  ;;  %v446_v16 = vld [vmem:[%s1203_s3 + $0x38] sm:$0xff]  ;;  %s661_s24 = sshll.u32 %s658_s22, 4  ;;  %s662_s24 = int_to_ptr.hbm [resolvable:$true] %s661_s24 }
  0x1a   : > { %s744_s29 = sshll.u32 %s1217_s28, 3  ;;  %460 = vmatpush.msra.mxu1 %v453_v7  ;;  %v445_v17 = vld [vmem:[%s1203_s3 + $0x30] sm:$0xff]  ;;  %v444_v18 = vld [vmem:[%s1203_s3 + $0x28] sm:$0xff]  ;;  %v443_v19 = vld [vmem:[%s1203_s3 + $0x20] sm:$0xff] }
  0x1b   : > { %s1032_s17 = scalar_lea.vmem %s1200_s0, %s744_s29  ;;  %v442_v21 = vld [vmem:[%s1203_s3 + $0x18] sm:$0xff]  ;;  %v441_v23 = vld [vmem:[%s1203_s3 + $0x10] sm:$0xff]  ;;  %v440_v24 = vld [vmem:[%s1203_s3 + $0x8] sm:$0xff] }
  0x1c   : > { %v351_v2 = vld [vmem:[%s1032_s17] sm:$0xff]  ;;  %v352_v3 = vld [vmem:[%s1032_s17 + $0x8] sm:$0xff]  ;;  %v353_v4 = vld [vmem:[%s1032_s17 + $0x10] sm:$0xff]  ;;  %461 = vmatpush.msra.mxu1 %v452_v8 }
  0x1d   : > { %745 = vmatmul.msk.f32.vlgmr.msra.gmra.mxu0 %vm365_vm0, %v351_v2  ;;  %v354_v5 = vld [vmem:[%s1032_s17 + $0x18] sm:$0xff]  ;;  %v355_v10 = vld [vmem:[%s1032_s17 + $0x20] sm:$0xff]  ;;  %v356_v15 = vld [vmem:[%s1032_s17 + $0x28] sm:$0xff] }
  0x1e   : > { %462 = vmatpush.msra.mxu1 %v451_v9  ;;  %v357_v20 = vld [vmem:[%s1032_s17 + $0x30] sm:$0xff]  ;;  %v358_v22 = vld [vmem:[%s1032_s17 + $0x38] sm:$0xff]  ;;  %v439_v25 = vld [vmem:[%s1203_s3] sm:$0xff]  ;;  %s341_s17 = sand.u32 1, %s905_s10  }
  0x1f   : > { %v813_v26 = vld [vmem:[%s1202_s2] ss:$0 sm:$0xff]  ;;  %v523_v39 = vld [vmem:[%s1205_s5 + $0x78] sm:$0xff]  ;;  %v522_v40 = vld [vmem:[%s1205_s5 + $0x70] sm:$0xff]  ;;  %s742_s26 = sshll.u32 %s341_s17, 6  ;;  %s647_s25 = scalar_lea.sflag [#allocation4], %s341_s17 }
  0x20   : > { %463 = vmatpush.msra.mxu1 %v450_v11  ;;  %528 = vmatpush.msra.mxu2 %v523_v39  ;;  %v521_v41 = vld [vmem:[%s1205_s5 + $0x68] sm:$0xff]  ;;  %v520_v44 = vld [vmem:[%s1205_s5 + $0x60] sm:$0xff]  ;;  %v519_v46 = vld [vmem:[%s1205_s5 + $0x58] sm:$0xff]  ;;  %s343_s29 = scalar_lea.vmem [#allocation5], %s742_s26  ;;  %s861_s26 = sshra.s32 %s662_s24, 4  ;;  %s862_s26 = int_to_ptr.hbm [resolvable:$true] %s861_s26 }
  0x21   : > { %v518_v47 = vld [vmem:[%s1205_s5 + $0x50] sm:$0xff]  ;;  %v517_v48 = vld [vmem:[%s1205_s5 + $0x48] sm:$0xff]  ;;  %v516_v51 = vld [vmem:[%s1205_s5 + $0x40] sm:$0xff]  ;;  %s659_s23 = sshll.u32 %s343_s29, 4  ;;  %s863_s13 = scalar_lea.hbm %s862_s26, 64  ;;  %s660_s23 = int_to_ptr.vmem [resolvable:$true] %s659_s23 }
  0x22   : > { %464 = vmatpush.msra.mxu1 %v449_v12  ;;  %529 = vmatpush.msra.mxu2 %v522_v40  ;;  %v515_v53 = vld [vmem:[%s1205_s5 + $0x38] sm:$0xff]  ;;  %v514_v54 = vld [vmem:[%s1205_s5 + $0x30] sm:$0xff]  ;;  %v513_v55 = vld [vmem:[%s1205_s5 + $0x28] sm:$0xff]  ;;  %p864_p0 = scmp.ne.s32.totalorder %s862_s26, %s863_s13  ;;  %p868_p3 = scmp.lt.s32.totalorder %s862_s26, %s1209_s9 }
  0x23   : > { %v512_v58 = vld [vmem:[%s1205_s5 + $0x20] sm:$0xff]  ;;  %v511_v60 = vld [vmem:[%s1205_s5 + $0x18] sm:$0xff]  ;;  %v510_v0 = vld [vmem:[%s1205_s5 + $0x10] sm:$0xff]  ;;  %p869_p4 = scmp.lt.s32.totalorder %s867_s14, %s863_s13 }
  0x24   : > { %465 = vmatpush.msra.mxu1 %v448_v13  ;;  %530 = vmatpush.msra.mxu2 %v521_v41  ;;  %v509_v1 = vld [vmem:[%s1205_s5 + $0x8] sm:$0xff]  ;;  %v508_v2 = vld [vmem:[%s1205_s5] sm:$0xff]  ;;  %v579_v41 = vld [vmem:[#allocation2 + $0x10] sm:$0xff]  ;;  %p865_p1 = pnand %p864_p0, %p1008_p5 }
  0x25   : > { %746 = vmatmul.msk.f32.gmra.mxu0 %vm365_vm0, %v352_v3  ;;  %v814_v3 = vld [vmem:[%s1204_s4] ss:$0 sm:$0xff]  ;;  %p870_p7 = por %p869_p4, %p868_p3 }
  0x26   : > { %466 = vmatpush.msra.mxu1 %v447_v14  ;;  %531 = vmatpush.msra.mxu2 %v520_v44  ;;  %v815_v44 = vld [vmem:[%s1206_s6] ss:$0 sm:$0xff]  ;;  %p866_p2 = pneg %p865_p1 }
  0x28   : > { %467 = vmatpush.msra.mxu1 %v446_v16  ;;  %532 = vmatpush.msra.mxu2 %v519_v46  ;;  %v592_v16 = vld [vmem:[#allocation2 + $0x78] sm:$0xff]  ;;  %p871_p8 = pnand %p870_p7, %p866_p2 }
  0x29   : > { %597 = vmatpush.msra.mxu3 %v592_v16 }
  0x2a   : > { %468 = vmatpush.msra.mxu1 %v445_v17  ;;  %533 = vmatpush.msra.mxu2 %v518_v47  ;;  %v591_v17 = vld [vmem:[#allocation2 + $0x70] sm:$0xff] }
  0x2b   : > { %598 = vmatpush.msra.mxu3 %v591_v17 }
  0x2c   : > { %469 = vmatpush.msra.mxu1 %v444_v18  ;;  %534 = vmatpush.msra.mxu2 %v517_v48  ;;  %v590_v18 = vld [vmem:[#allocation2 + $0x68] sm:$0xff] }
  0x2d   : > { %747 = vmatmul.msk.f32.gmra.mxu0 %vm365_vm0, %v353_v4  ;;  %599 = vmatpush.msra.mxu3 %v590_v18 }
  0x2e   : > { %470 = vmatpush.msra.mxu1 %v443_v19  ;;  %535 = vmatpush.msra.mxu2 %v516_v51 }
  0x30   : > { %471 = vmatpush.msra.mxu1 %v442_v21  ;;  %536 = vmatpush.msra.mxu2 %v515_v53  ;;  %v589_v21 = vld [vmem:[#allocation2 + $0x60] sm:$0xff] }
  0x31   : > { %600 = vmatpush.msra.mxu3 %v589_v21 }
  0x32   : > { %472 = vmatpush.msra.mxu1 %v441_v23  ;;  %537 = vmatpush.msra.mxu2 %v514_v54  ;;  %v588_v23 = vld [vmem:[#allocation2 + $0x58] sm:$0xff] }
  0x33   : > { %601 = vmatpush.msra.mxu3 %v588_v23 }
  0x34   : > { %473 = vmatpush.msra.mxu1 %v440_v24  ;;  %538 = vmatpush.msra.mxu2 %v513_v55  ;;  %v587_v24 = vld [vmem:[#allocation2 + $0x50] sm:$0xff] }
  0x35   : > { %748 = vmatmul.msk.f32.gmra.mxu0 %vm365_vm0, %v354_v5  ;;  %602 = vmatpush.msra.mxu3 %v587_v24 }
  0x36   : > { %474 = vmatpush.msra.mxu1 %v439_v25  ;;  %539 = vmatpush.msra.mxu2 %v512_v58  ;;  %v586_v25 = vld [vmem:[#allocation2 + $0x48] sm:$0xff] }
  0x37   : > { %603 = vmatpush.msra.mxu3 %v586_v25 }
  0x38   : > { %540 = vmatpush.msra.mxu2 %v511_v60 }
  0x3a   : > { %541 = vmatpush.msra.mxu2 %v510_v0 }
  0x3c   : > { %542 = vmatpush.msra.mxu2 %v509_v1 }
  0x3d   : > { %749 = vmatmul.msk.f32.gmra.mxu0 %vm365_vm0, %v355_v10 }
  0x3e   : > { %543 = vmatpush.msra.mxu2 %v508_v2 }
  0x45   : > { %750 = vmatmul.msk.f32.gmra.mxu0 %vm365_vm0, %v356_v15 }
  0x4d   : > { %751 = vmatmul.msk.f32.gmra.mxu0 %vm365_vm0, %v357_v20 }
  0x55   : > { %752 = vmatmul.msk.f32.gmra.mxu0 %vm365_vm0, %v358_v22 }
  0x9a   : > { %v407_v27 = vpop.f32.mrf.mxu0 }
  0x9b   : > { %v408_v28 = vadd.f32 %v813_v26, %v407_v27 }
  0x9d   : > { %v431_v29 = vmax.f32 %v408_v28, 0.0  ;;  %v585_v28 = vld [vmem:[#allocation2 + $0x40] sm:$0xff] }
  0x9e   : > { %604 = vmatpush.msra.mxu3 %v585_v28 }
  0x9f   : > { %475 = vmatmul.f32.vlgmr.msra.gmra.mxu1 %v431_v29 }
  0xa2   : > { %v410_v30 = vpop.f32.mrf.mxu0 }
  0xa3   : > { %v411_v31 = vadd.f32 %v813_v26, %v410_v30  ;;  %v584_v30 = vld [vmem:[#allocation2 + $0x38] sm:$0xff] }
  0xa4   : > { %605 = vmatpush.msra.mxu3 %v584_v30 }
  0xa5   : > { %v432_v32 = vmax.f32 %v411_v31, 0.0  ;;  %v583_v31 = vld [vmem:[#allocation2 + $0x30] sm:$0xff] }
  0xa6   : > { %606 = vmatpush.msra.mxu3 %v583_v31 }
  0xa7   : > { %478 = vmatmul.f32.gmra.mxu1 %v432_v32  ;;  %v582_v32 = vld [vmem:[#allocation2 + $0x28] sm:$0xff] }
  0xa8   : > { %607 = vmatpush.msra.mxu3 %v582_v32 }
  0xaa   : > { %v413_v33 = vpop.f32.mrf.mxu0 }
  0xab   : > { %v414_v34 = vadd.f32 %v813_v26, %v413_v33 }
  0xad   : > { %v433_v35 = vmax.f32 %v414_v34, 0.0 }
  0xaf   : > { %481 = vmatmul.f32.gmra.mxu1 %v433_v35  ;;  %v581_v35 = vld [vmem:[#allocation2 + $0x20] sm:$0xff] }
  0xb0   : > { %608 = vmatpush.msra.mxu3 %v581_v35 }
  0xb2   : > { %v416_v36 = vpop.f32.mrf.mxu0 }
  0xb3   : > { %v417_v37 = vadd.f32 %v813_v26, %v416_v36 }
  0xb5   : > { %v434_v38 = vmax.f32 %v417_v37, 0.0  ;;  %v580_v37 = vld [vmem:[#allocation2 + $0x18] sm:$0xff] }
  0xb6   : > { %609 = vmatpush.msra.mxu3 %v580_v37 }
  0xb7   : > { %484 = vmatmul.f32.gmra.mxu1 %v434_v38 }
  0xb8   : > { %610 = vmatpush.msra.mxu3 %v579_v41 }
  0xba   : > { %v419_v42 = vpop.f32.mrf.mxu0 }
  0xbb   : > { %v420_v43 = vadd.f32 %v813_v26, %v419_v42  ;;  %v578_v42 = vld [vmem:[#allocation2 + $0x8] sm:$0xff] }
  0xbc   : > { %611 = vmatpush.msra.mxu3 %v578_v42 }
  0xbd   : > { %v435_v45 = vmax.f32 %v420_v43, 0.0  ;;  %v577_v43 = vld [vmem:[#allocation2] sm:$0xff] }
  0xbe   : > { %612 = vmatpush.msra.mxu3 %v577_v43 }
  0xbf   : > { %487 = vmatmul.f32.gmra.mxu1 %v435_v45 }
  0xc2   : > { %v422_v49 = vpop.f32.mrf.mxu0 }
  0xc3   : > { %v423_v50 = vadd.f32 %v813_v26, %v422_v49 }
  0xc5   : > { %v436_v52 = vmax.f32 %v423_v50, 0.0 }
  0xc7   : > { %490 = vmatmul.f32.gmra.mxu1 %v436_v52 }
  0xca   : > { %v425_v56 = vpop.f32.mrf.mxu0 }
  0xcb   : > { %v426_v57 = vadd.f32 %v813_v26, %v425_v56 }
  0xcd   : > { %v437_v59 = vmax.f32 %v426_v57, 0.0 }
  0xcf   : > { %493 = vmatmul.f32.gmra.mxu1 %v437_v59 }
  0xd2   : > { %v428_v61 = vpop.f32.mrf.mxu0 }
  0xd3   : > { %v429_v62 = vadd.f32 %v813_v26, %v428_v61 }
  0xd5   : > { %v438_v63 = vmax.f32 %v429_v62, 0.0 }
  0xd7   : > { %496 = vmatmul.f32.gmra.mxu1 %v438_v63 }
 0x11c   : > { %v476_v4 = vpop.f32.mrf.mxu1 }
 0x11d   : > { %v477_v5 = vadd.f32 %v814_v3, %v476_v4 }
 0x11f   : > { %v500_v6 = vmax.f32 %v477_v5, 0.0  ;;  %v816_v5 = vld [vmem:[%s1208_s8] ss:$0 sm:$0xff] }
 0x121   : > { %544 = vmatmul.f32.vlgmr.msra.gmra.mxu2 %v500_v6 }
 0x124   : > { %v479_v7 = vpop.f32.mrf.mxu1 }
 0x125   : > { %v480_v8 = vadd.f32 %v814_v3, %v479_v7 }
 0x127   : > { %v501_v9 = vmax.f32 %v480_v8, 0.0 }
 0x129   : > { %547 = vmatmul.f32.gmra.mxu2 %v501_v9 }
 0x12c   : > { %v482_v10 = vpop.f32.mrf.mxu1 }
 0x12d   : > { %v483_v11 = vadd.f32 %v814_v3, %v482_v10 }
 0x12f   : > { %v502_v12 = vmax.f32 %v483_v11, 0.0 }
 0x131   : > { %550 = vmatmul.f32.gmra.mxu2 %v502_v12 }
 0x134   : > { %v485_v13 = vpop.f32.mrf.mxu1 }
 0x135   : > { %v486_v14 = vadd.f32 %v814_v3, %v485_v13 }
 0x137   : > { %v503_v15 = vmax.f32 %v486_v14, 0.0 }
 0x139   : > { %553 = vmatmul.f32.gmra.mxu2 %v503_v15 }
 0x13c   : > { %v488_v19 = vpop.f32.mrf.mxu1 }
 0x13d   : > { %v489_v20 = vadd.f32 %v814_v3, %v488_v19 }
 0x13f   : > { %v504_v22 = vmax.f32 %v489_v20, 0.0 }
 0x141   : > { %556 = vmatmul.f32.gmra.mxu2 %v504_v22 }
 0x144   : > { %v491_v26 = vpop.f32.mrf.mxu1 }
 0x145   : > { %v492_v27 = vadd.f32 %v814_v3, %v491_v26 }
 0x147   : > { %v505_v29 = vmax.f32 %v492_v27, 0.0 }
 0x149   : > { %559 = vmatmul.f32.gmra.mxu2 %v505_v29 }
 0x14c   : > { %v494_v33 = vpop.f32.mrf.mxu1 }
 0x14d   : > { %v495_v34 = vadd.f32 %v814_v3, %v494_v33 }
 0x14f   : > { %v506_v36 = vmax.f32 %v495_v34, 0.0 }
 0x151   : > { %562 = vmatmul.f32.gmra.mxu2 %v506_v36 }
 0x154   : > { %v497_v38 = vpop.f32.mrf.mxu1 }
 0x155   : > { %v498_v39 = vadd.f32 %v814_v3, %v497_v38 }
 0x157   : > { %v507_v40 = vmax.f32 %v498_v39, 0.0 }
 0x159   : > { %565 = vmatmul.f32.gmra.mxu2 %v507_v40 }
 0x1a4   : > { %v545_v45 = vpop.f32.mrf.mxu2 }
 0x1a5   : > { %v546_v46 = vadd.f32 %v815_v44, %v545_v45 }
 0x1a7   : > { %v569_v47 = vmax.f32 %v546_v46, 0.0 }
 0x1a9   : > { %613 = vmatmul.f32.vlgmr.msra.gmra.mxu3 %v569_v47 }
 0x1ac   : > { %v548_v48 = vpop.f32.mrf.mxu2 }
 0x1ad   : > { %v549_v49 = vadd.f32 %v815_v44, %v548_v48 }
 0x1af   : > { %v570_v50 = vmax.f32 %v549_v49, 0.0 }
 0x1b1   : > { %616 = vmatmul.f32.gmra.mxu3 %v570_v50 }
 0x1b4   : > { %v551_v51 = vpop.f32.mrf.mxu2 }
 0x1b5   : > { %v552_v52 = vadd.f32 %v815_v44, %v551_v51 }
 0x1b7   : > { %v571_v53 = vmax.f32 %v552_v52, 0.0 }
 0x1b9   : > { %619 = vmatmul.f32.gmra.mxu3 %v571_v53 }
 0x1bc   : > { %v554_v54 = vpop.f32.mrf.mxu2 }
 0x1bd   : > { %v555_v55 = vadd.f32 %v815_v44, %v554_v54 }
 0x1bf   : > { %v572_v56 = vmax.f32 %v555_v55, 0.0 }
 0x1c1   : > { %622 = vmatmul.f32.gmra.mxu3 %v572_v56 }
 0x1c4   : > { %v557_v57 = vpop.f32.mrf.mxu2 }
 0x1c5   : > { %v558_v58 = vadd.f32 %v815_v44, %v557_v57 }
 0x1c7   : > { %v573_v59 = vmax.f32 %v558_v58, 0.0 }
 0x1c9   : > { %625 = vmatmul.f32.gmra.mxu3 %v573_v59 }
 0x1cc   : > { %v560_v60 = vpop.f32.mrf.mxu2 }
 0x1cd   : > { %v561_v61 = vadd.f32 %v815_v44, %v560_v60 }
 0x1cf   : > { %v574_v62 = vmax.f32 %v561_v61, 0.0 }
 0x1d1   : > { %628 = vmatmul.f32.gmra.mxu3 %v574_v62 }
 0x1d4   : > { %v563_v63 = vpop.f32.mrf.mxu2 }
 0x1d5   : > { %v564_v0 = vadd.f32 %v815_v44, %v563_v63 }
 0x1d7   : > { %v575_v1 = vmax.f32 %v564_v0, 0.0 }
 0x1d9   : > { %631 = vmatmul.f32.gmra.mxu3 %v575_v1 }
 0x1dc   : > { %v566_v2 = vpop.f32.mrf.mxu2 }
 0x1dd   : > { %v567_v3 = vadd.f32 %v815_v44, %v566_v2 }
 0x1df   : > { %v576_v4 = vmax.f32 %v567_v3, 0.0 }
 0x1e1   : > { %634 = vmatmul.f32.gmra.mxu3 %v576_v4 }
 0x22c   : > { %v614_v6 = vpop.f32.mrf.mxu3 }
 0x22d   : > { %v615_v7 = vadd.f32 %v816_v5, %v614_v6 }
 0x22f   : > { %638 = vst [vmem:[%s343_s29] sm:$0xff] %v615_v7 }
 0x234   : > { %v617_v8 = vpop.f32.mrf.mxu3 }
 0x235   : > { %v618_v9 = vadd.f32 %v816_v5, %v617_v8 }
 0x237   : > { %639 = vst [vmem:[%s343_s29 + $0x8] sm:$0xff] %v618_v9 }
 0x23c   : > { %v620_v10 = vpop.f32.mrf.mxu3 }
 0x23d   : > { %v621_v11 = vadd.f32 %v816_v5, %v620_v10 }
 0x23f   : > { %640 = vst [vmem:[%s343_s29 + $0x10] sm:$0xff] %v621_v11 }
 0x244   : > { %v623_v12 = vpop.f32.mrf.mxu3 }
 0x245   : > { %v624_v13 = vadd.f32 %v816_v5, %v623_v12 }
 0x247   : > { %641 = vst [vmem:[%s343_s29 + $0x18] sm:$0xff] %v624_v13 }
 0x24c   : > { %v626_v14 = vpop.f32.mrf.mxu3 }
 0x24d   : > { %v627_v15 = vadd.f32 %v816_v5, %v626_v14 }
 0x24f   : > { %642 = vst [vmem:[%s343_s29 + $0x20] sm:$0xff] %v627_v15 }
 0x254   : > { %v629_v16 = vpop.f32.mrf.mxu3 }
 0x255   : > { %v630_v17 = vadd.f32 %v816_v5, %v629_v16 }
 0x257   : > { %643 = vst [vmem:[%s343_s29 + $0x28] sm:$0xff] %v630_v17 }
 0x25c   : > { %v632_v18 = vpop.f32.mrf.mxu3 }
 0x25d   : > { %v633_v19 = vadd.f32 %v816_v5, %v632_v18 }
 0x25f   : > { %644 = vst [vmem:[%s343_s29 + $0x30] sm:$0xff] %v633_v19 }
 0x264   : > { %v635_v20 = vpop.f32.mrf.mxu3 }
 0x265   : > { %v636_v21 = vadd.f32 %v816_v5, %v635_v20 }
 0x267   : > { %645 = vst [vmem:[%s343_s29 + $0x38] sm:$0xff] %v636_v21 }
 0x268   : > { %874 = shalt.err (!%p871_p8)
}
 0x269   : > { %s918_s17 = smov 128   ;;  %s919_s29 = smov 8  }
 0x26a   : > { %763 = dma.vmem_to_hbm [thread:$0]  (%p1008_p5), %s660_s23, 1024, %s662_s24, %s647_s25, %s918_s17, %s918_s17, %s919_s29  }
 0x26b PF: > { %p775_p9 = scmp.ge.s32.totalorder %s913_s12, 2  ;;  %s676_s22 = sand.u32 1, %s901_s30  }
 0x26c   : > { %s677_s27 = scalar_lea.sflag [#allocation4], %s676_s22 }
 0x26d   : > { %p770_p10 = pnand %p775_p9, %p1012_p6 }
 0x26f   : > { %p771_p11 = pneg %p770_p10 }
 0x271   : > { %896 = dma.done.wait (%p771_p11), %s677_s27, 1024  }
 0x272   : > { %898 = vsyncadd (%p771_p11), %s677_s27, 4294966272  ;;  %p20_p12 = scmp.ge.s32.totalorder %s995_s15, 6   ;;  %s1212_s30 = smov %s905_s10 }
 0x273   : > { %s1213_s10 = smov %s909_s11  ;;  %s1214_s11 = smov %s1006_s18 }
 0x274   : > { %s1215_s12 = smov %s995_s15  ;;  %22 = sbr.rel (!%p20_p12) target bundleno = 4 (0x4), region = 96 }
 0x279   :  { %683 = vsyncpa [#allocation3], 1 }
 0x27a   :  { %685 = vsyncpa [#allocation3 + $0x1], 1 }
 0x27b   :  { %686 = vsyncpa [#allocation4], 1 }
 0x27c   :  { %688 = vsyncpa [#allocation4 + $0x1], 1 }

</bundles_post_ra>
